<compile_context>
chip_gen: v7x
topology: tpu7x:2x2x1
jax: 0.10.0
libtpu: 0.0.40
codegen_flags: <defaults>
</compile_context>

<pallas_src>
import functools
import math

import jax
import jax.numpy as jnp
from jax.experimental import pallas as pl
from jax.experimental.pallas import tpu as pltpu


def _causal_attn_kernel(x_ref, wqkv_ref, bqkv_ref, wp_ref, bp_ref, o_ref, *,
                        n_head, matmul_dtype):
    """Causal self-attention for ONE batch element (grid axis = batch).

    x_ref:    (T, C)    activations for this batch element
    wqkv_ref: (C, 3C)   fused QKV weight, columns = [Q | K | V], head-major in D
    bqkv_ref: (1, 3C)   fused QKV bias
    wp_ref:   (C, C)    output projection weight
    bp_ref:   (1, C)    output projection bias
    o_ref:    (T, C)    output for this batch element
    """
    T, C = x_ref.shape
    H = n_head
    D = C // H
    scale = 1.0 / math.sqrt(D)

    # ---- fused QKV projection: one wide MXU matmul, f32 accumulation --------
    x = x_ref[...].astype(matmul_dtype)                               # (T, C)
    qkv = jnp.dot(x, wqkv_ref[...],
                  preferred_element_type=jnp.float32)                 # (T, 3C)
    qkv = qkv + bqkv_ref[...]                                         # f32 bias add

    # Bias add + scale fold stay in f32 before any matmul cast.
    q = qkv[:, 0 * C:1 * C] * scale                                   # (T, C)
    k = qkv[:, 1 * C:2 * C]
    v = qkv[:, 2 * C:3 * C]

    # Per-head views: static lane slices stacked on a leading batch dim.
    qh = jnp.stack([q[:, h * D:(h + 1) * D] for h in range(H)], axis=0)
    kh = jnp.stack([k[:, h * D:(h + 1) * D] for h in range(H)], axis=0)
    vh = jnp.stack([v[:, h * D:(h + 1) * D] for h in range(H)], axis=0)
    qh = qh.astype(matmul_dtype)                                      # (H, T, D)
    kh = kh.astype(matmul_dtype)
    vh = vh.astype(matmul_dtype)

    # ---- attention scores, causal mask, softmax (all-f32 elementwise) -------
    s = jnp.einsum("hqd,hkd->hqk", qh, kh,
                   preferred_element_type=jnp.float32)                # (H, T, T)
    row = jax.lax.broadcasted_iota(jnp.int32, (T, T), 0)
    col = jax.lax.broadcasted_iota(jnp.int32, (T, T), 1)
    causal = row >= col
    s = jnp.where(causal[None], s, jnp.float32(-1e30))   # finite: no NaN hazard

    m = jnp.max(s, axis=-1, keepdims=True)
    e = jnp.exp(s - m)                                                # (H, T, T)
    l = jnp.sum(e, axis=-1, keepdims=True)                            # (H, T, 1)

    # PV matmul on the unnormalised weights, then exact normalisation of the
    # (H,T,D) result (cheaper than normalising the (H,T,T) tensor, and exact
    # division fixes the previous approx-reciprocal accuracy failure).
    y = jnp.einsum("hqk,hkd->hqd", e.astype(matmul_dtype), vh,
                   preferred_element_type=jnp.float32)                # (H, T, D)
    y = y / l

    # ---- output projection: heads back on lanes, one K=C matmul -------------
    yc = jnp.concatenate([y[h] for h in range(H)], axis=-1)           # (T, C)
    out = jnp.dot(yc.astype(matmul_dtype), wp_ref[...],
                  preferred_element_type=jnp.float32) + bp_ref[...]   # (T, C)

    # C=32 < 128 -> masked store; acceptable at this toy size.
    o_ref[...] = out.astype(o_ref.dtype)


def causal_self_attention(x, params, n_head, *, matmul_dtype=jnp.float32):
    """x: (B, T, C). params: wq/wk/wv/wp of shape (C_in, C_out)=(C, C) and
    bq/bk/bv/bp of shape (1, C). Semantics match the PyTorch module (eval)."""
    B, T, C = x.shape
    assert C % n_head == 0

    # ----- host-side weight packing (layout plumbing, outside the kernel) ----
    # Column layout [Q | K | V]; within each block the original Linear ordering
    # (head-major, D-minor) is preserved, so per-head q/k/v are static lane
    # slices in the kernel and the output-projection weight is used as-is.
    wqkv = jnp.concatenate([params["wq"], params["wk"], params["wv"]],
                           axis=1).astype(matmul_dtype)               # (C, 3C)
    bqkv = jnp.concatenate([params["bq"], params["bk"], params["bv"]],
                           axis=1).astype(jnp.float32)                # (1, 3C)
    wp = params["wp"].astype(matmul_dtype)                            # (C, C)
    bp = params["bp"].astype(jnp.float32)                             # (1, C)

    x2d = x.reshape(B * T, C)

    out2d = pl.pallas_call(
        functools.partial(_causal_attn_kernel, n_head=n_head,
                          matmul_dtype=matmul_dtype),
        out_shape=jax.ShapeDtypeStruct((B * T, C), x.dtype),
        grid=(B,),
        in_specs=[
            pl.BlockSpec((T, C), lambda b: (b, 0)),        # per-batch x rows
            pl.BlockSpec((C, 3 * C), lambda b: (0, 0)),    # fused QKV weight
            pl.BlockSpec((1, 3 * C), lambda b: (0, 0)),    # fused QKV bias
            pl.BlockSpec((C, C), lambda b: (0, 0)),        # proj weight
            pl.BlockSpec((1, C), lambda b: (0, 0)),        # proj bias
        ],
        out_specs=pl.BlockSpec((T, C), lambda b: (b, 0)),
        compiler_params=pltpu.CompilerParams(
            dimension_semantics=("parallel",)),            # megacore on v7x
    )(x2d, wqkv, bqkv, wp, bp)
    return out2d.reshape(B, T, C)


def _reference(x, params, n_head):
    """Pure-JAX reference mirroring the PyTorch forward (eval mode)."""
    B, T, C = x.shape
    D = C // n_head
    xf = x.astype(jnp.float32)

    def lin(w, b):
        return jnp.einsum("btc,cd->btd", xf, w) + b[0]

    q = lin(params["wq"], params["bq"]).reshape(B, T, n_head, D).transpose(0, 2, 1, 3)
    k = lin(params["wk"], params["bk"]).reshape(B, T, n_head, D).transpose(0, 2, 1, 3)
    v = lin(params["wv"], params["bv"]).reshape(B, T, n_head, D).transpose(0, 2, 1, 3)

    att = jnp.einsum("bhtd,bhsd->bhts", q, k) * (1.0 / math.sqrt(D))
    mask = jnp.tril(jnp.ones((T, T), dtype=bool))
    att = jnp.where(mask[None, None], att, -jnp.inf)
    att = jax.nn.softmax(att, axis=-1)
    y = jnp.einsum("bhts,bhsd->bhtd", att, v)
    y = y.transpose(0, 2, 1, 3).reshape(B, T, C)
    y = jnp.einsum("btc,cd->btd", y, params["wp"]) + params["bp"][0]
    return y.astype(x.dtype)


if __name__ == "__main__":
    # Small config consistent with the module: n_embd=32, n_head=4, seq T=8.
    B, T, C, n_head = 2, 8, 32, 4

    key = jax.random.PRNGKey(0)
    keys = jax.random.split(key, 9)
    scale = 1.0 / math.sqrt(C)
    params = {
        "wq": jax.random.normal(keys[0], (C, C), jnp.float32) * scale,
        "wk": jax.random.normal(keys[1], (C, C), jnp.float32) * scale,
        "wv": jax.random.normal(keys[2], (C, C), jnp.float32) * scale,
        "wp": jax.random.normal(keys[3], (C, C), jnp.float32) * scale,
        "bq": jax.random.normal(keys[4], (1, C), jnp.float32) * 0.01,
        "bk": jax.random.normal(keys[5], (1, C), jnp.float32) * 0.01,
        "bv": jax.random.normal(keys[6], (1, C), jnp.float32) * 0.01,
        "bp": jax.random.normal(keys[7], (1, C), jnp.float32) * 0.01,
    }
    x = jax.random.normal(keys[8], (B, T, C), jnp.float32)

    # f32 MXU operands for exact parity with the f32 reference; pass
    # matmul_dtype=jnp.bfloat16 on v6e/v7x for the higher-throughput path.
    out = jax.block_until_ready(causal_self_attention(x, params, n_head))

    ref = _reference(x, params, n_head)
    assert out.shape == (B, T, C)
    max_err = float(jnp.max(jnp.abs(out - ref)))
    assert jnp.allclose(out, ref, atol=1e-4, rtol=1e-4), (
        f"mismatch vs reference (max abs err {max_err:.3e})")

    print("KERNEL_OK")
</pallas_src>

<mosaic_0001>
module attributes {stable_mosaic.version = 11 : i64} {
  func.func @_causal_attn_kernel(%arg0: i32, %arg1: memref<8x32xf32, #tpu.memory_space<vmem>>, %arg2: memref<32x96xf32, #tpu.memory_space<vmem>>, %arg3: memref<1x96xf32, #tpu.memory_space<vmem>>, %arg4: memref<32x32xf32, #tpu.memory_space<vmem>>, %arg5: memref<1x32xf32, #tpu.memory_space<vmem>>, %arg6: memref<8x32xf32, #tpu.memory_space<vmem>>) attributes {dimension_semantics = [#tpu.dimension_semantics<parallel>], iteration_bounds = array<i64: 2>, scalar_prefetch = 0 : i64, scratch_operands = 0 : i64, tpu.core_type = #tpu.core_type<tc>, window_params = [{transform_indices = @transform_0, window_bounds = array<i64: 8, 32>}, {pipeline_mode = #tpu.pipeline_mode<synchronous>, transform_indices = @transform_1, window_bounds = array<i64: 32, 96>}, {pipeline_mode = #tpu.pipeline_mode<synchronous>, transform_indices = @transform_2, window_bounds = array<i64: 1, 96>}, {pipeline_mode = #tpu.pipeline_mode<synchronous>, transform_indices = @transform_3, window_bounds = array<i64: 32, 32>}, {pipeline_mode = #tpu.pipeline_mode<synchronous>, transform_indices = @transform_4, window_bounds = array<i64: 1, 32>}, {transform_indices = @transform_5, window_bounds = array<i64: 8, 32>}]} {
    %c0 = arith.constant 0 : index
    %c0_0 = arith.constant 0 : index
    %0 = vector.load %arg1[%c0, %c0_0] : memref<8x32xf32, #tpu.memory_space<vmem>>, vector<8x32xf32>
    %c0_1 = arith.constant 0 : index
    %c0_2 = arith.constant 0 : index
    %1 = vector.load %arg2[%c0_1, %c0_2] : memref<32x96xf32, #tpu.memory_space<vmem>>, vector<32x96xf32>
    %cst = arith.constant dense<0.000000e+00> : vector<8x96xf32>
    %2 = tpu.matmul %0, %1, %cst {dimension_numbers = #tpu.dot_dimension_numbers<[1], [0], [0], [1], [0, 0, 1, 1], [], []>} : vector<8x32xf32>, vector<32x96xf32>, vector<8x96xf32> -> vector<8x96xf32>
    %c0_3 = arith.constant 0 : index
    %c0_4 = arith.constant 0 : index
    %3 = vector.load %arg3[%c0_3, %c0_4] : memref<1x96xf32, #tpu.memory_space<vmem>>, vector<1x96xf32>
    %4 = vector.broadcast %3 : vector<1x96xf32> to vector<8x96xf32>
    %5 = arith.addf %2, %4 : vector<8x96xf32>
    %6 = vector.extract_strided_slice %5 {offsets = [0, 0], sizes = [8, 32], strides = [1, 1]} : vector<8x96xf32> to vector<8x32xf32>
    %cst_5 = arith.constant 0.353553385 : f32
    %7 = vector.broadcast %cst_5 : f32 to vector<8x32xf32>
    %8 = arith.mulf %6, %7 : vector<8x32xf32>
    %9 = vector.extract_strided_slice %5 {offsets = [0, 32], sizes = [8, 32], strides = [1, 1]} : vector<8x96xf32> to vector<8x32xf32>
    %10 = vector.extract_strided_slice %5 {offsets = [0, 64], sizes = [8, 32], strides = [1, 1]} : vector<8x96xf32> to vector<8x32xf32>
    %11 = vector.extract_strided_slice %8 {offsets = [0, 0], sizes = [8, 8], strides = [1, 1]} : vector<8x32xf32> to vector<8x8xf32>
    %12 = vector.extract_strided_slice %8 {offsets = [0, 8], sizes = [8, 8], strides = [1, 1]} : vector<8x32xf32> to vector<8x8xf32>
    %13 = vector.extract_strided_slice %8 {offsets = [0, 16], sizes = [8, 8], strides = [1, 1]} : vector<8x32xf32> to vector<8x8xf32>
    %14 = vector.extract_strided_slice %8 {offsets = [0, 24], sizes = [8, 8], strides = [1, 1]} : vector<8x32xf32> to vector<8x8xf32>
    %15 = vector.shape_cast %11 : vector<8x8xf32> to vector<1x8x8xf32>
    %16 = vector.shape_cast %12 : vector<8x8xf32> to vector<1x8x8xf32>
    %17 = vector.shape_cast %13 : vector<8x8xf32> to vector<1x8x8xf32>
    %18 = vector.shape_cast %14 : vector<8x8xf32> to vector<1x8x8xf32>
    %19 = tpu.concatenate %15, %16, %17, %18 in 0 : vector<1x8x8xf32>, vector<1x8x8xf32>, vector<1x8x8xf32>, vector<1x8x8xf32> -> vector<4x8x8xf32>
    %20 = vector.extract_strided_slice %9 {offsets = [0, 0], sizes = [8, 8], strides = [1, 1]} : vector<8x32xf32> to vector<8x8xf32>
    %21 = vector.extract_strided_slice %9 {offsets = [0, 8], sizes = [8, 8], strides = [1, 1]} : vector<8x32xf32> to vector<8x8xf32>
    %22 = vector.extract_strided_slice %9 {offsets = [0, 16], sizes = [8, 8], strides = [1, 1]} : vector<8x32xf32> to vector<8x8xf32>
    %23 = vector.extract_strided_slice %9 {offsets = [0, 24], sizes = [8, 8], strides = [1, 1]} : vector<8x32xf32> to vector<8x8xf32>
    %24 = vector.shape_cast %20 : vector<8x8xf32> to vector<1x8x8xf32>
    %25 = vector.shape_cast %21 : vector<8x8xf32> to vector<1x8x8xf32>
    %26 = vector.shape_cast %22 : vector<8x8xf32> to vector<1x8x8xf32>
    %27 = vector.shape_cast %23 : vector<8x8xf32> to vector<1x8x8xf32>
    %28 = tpu.concatenate %24, %25, %26, %27 in 0 : vector<1x8x8xf32>, vector<1x8x8xf32>, vector<1x8x8xf32>, vector<1x8x8xf32> -> vector<4x8x8xf32>
    %29 = vector.extract_strided_slice %10 {offsets = [0, 0], sizes = [8, 8], strides = [1, 1]} : vector<8x32xf32> to vector<8x8xf32>
    %30 = vector.extract_strided_slice %10 {offsets = [0, 8], sizes = [8, 8], strides = [1, 1]} : vector<8x32xf32> to vector<8x8xf32>
    %31 = vector.extract_strided_slice %10 {offsets = [0, 16], sizes = [8, 8], strides = [1, 1]} : vector<8x32xf32> to vector<8x8xf32>
    %32 = vector.extract_strided_slice %10 {offsets = [0, 24], sizes = [8, 8], strides = [1, 1]} : vector<8x32xf32> to vector<8x8xf32>
    %33 = vector.shape_cast %29 : vector<8x8xf32> to vector<1x8x8xf32>
    %34 = vector.shape_cast %30 : vector<8x8xf32> to vector<1x8x8xf32>
    %35 = vector.shape_cast %31 : vector<8x8xf32> to vector<1x8x8xf32>
    %36 = vector.shape_cast %32 : vector<8x8xf32> to vector<1x8x8xf32>
    %37 = tpu.concatenate %33, %34, %35, %36 in 0 : vector<1x8x8xf32>, vector<1x8x8xf32>, vector<1x8x8xf32>, vector<1x8x8xf32> -> vector<4x8x8xf32>
    "tpu.trace_start"() <{level = 10 : i32, message = "hqd,hkd->hqk"}> : () -> ()
    %cst_6 = arith.constant dense<0.000000e+00> : vector<4x8x8xf32>
    %38 = tpu.matmul %19, %28, %cst_6 {dimension_numbers = #tpu.dot_dimension_numbers<[2], [2], [1], [1], [0, 0, 0, 1, 1, 1], [0], [0]>} : vector<4x8x8xf32>, vector<4x8x8xf32>, vector<4x8x8xf32> -> vector<4x8x8xf32>
    "tpu.trace_stop"() : () -> ()
    %39 = tpu.iota {dimensions = array<i32: 0>} : vector<8x8xi32>
    %40 = tpu.iota {dimensions = array<i32: 1>} : vector<8x8xi32>
    %41 = arith.cmpi sge, %39, %40 : vector<8x8xi32>
    %42 = vector.shape_cast %41 : vector<8x8xi1> to vector<1x8x8xi1>
    %cst_7 = arith.constant -1.000000e+30 : f32
    %43 = vector.shape_cast %42 : vector<1x8x8xi1> to vector<1x8x8xi1>
    %44 = vector.broadcast %43 : vector<1x8x8xi1> to vector<4x8x8xi1>
    %45 = vector.broadcast %cst_7 : f32 to vector<4x8x8xf32>
    %46 = arith.select %44, %38, %45 : vector<4x8x8xi1>, vector<4x8x8xf32>
    %cst_8 = arith.constant dense<0xFF800000> : vector<4x8xf32>
    %47 = vector.multi_reduction <maximumf>, %46, %cst_8 [2] : vector<4x8x8xf32> to vector<4x8xf32>
    %48 = vector.shape_cast %47 : vector<4x8xf32> to vector<4x8x1xf32>
    %49 = vector.broadcast %48 : vector<4x8x1xf32> to vector<4x8x8xf32>
    %50 = arith.subf %46, %49 : vector<4x8x8xf32>
    %51 = math.exp %50 : vector<4x8x8xf32>
    %cst_9 = arith.constant dense<0.000000e+00> : vector<4x8xf32>
    %52 = vector.multi_reduction <add>, %51, %cst_9 [2] : vector<4x8x8xf32> to vector<4x8xf32>
    %53 = vector.shape_cast %52 : vector<4x8xf32> to vector<4x8x1xf32>
    "tpu.trace_start"() <{level = 10 : i32, message = "hqk,hkd->hqd"}> : () -> ()
    %cst_10 = arith.constant dense<0.000000e+00> : vector<4x8x8xf32>
    %54 = tpu.matmul %51, %37, %cst_10 {dimension_numbers = #tpu.dot_dimension_numbers<[2], [1], [1], [2], [0, 0, 0, 1, 1, 2], [0], [0]>} : vector<4x8x8xf32>, vector<4x8x8xf32>, vector<4x8x8xf32> -> vector<4x8x8xf32>
    "tpu.trace_stop"() : () -> ()
    %55 = vector.broadcast %53 : vector<4x8x1xf32> to vector<4x8x8xf32>
    %56 = arith.divf %54, %55 : vector<4x8x8xf32>
    %57 = vector.extract_strided_slice %56 {offsets = [0, 0, 0], sizes = [1, 8, 8], strides = [1, 1, 1]} : vector<4x8x8xf32> to vector<1x8x8xf32>
    %58 = vector.shape_cast %57 : vector<1x8x8xf32> to vector<8x8xf32>
    %59 = vector.extract_strided_slice %56 {offsets = [1, 0, 0], sizes = [1, 8, 8], strides = [1, 1, 1]} : vector<4x8x8xf32> to vector<1x8x8xf32>
    %60 = vector.shape_cast %59 : vector<1x8x8xf32> to vector<8x8xf32>
    %61 = vector.extract_strided_slice %56 {offsets = [2, 0, 0], sizes = [1, 8, 8], strides = [1, 1, 1]} : vector<4x8x8xf32> to vector<1x8x8xf32>
    %62 = vector.shape_cast %61 : vector<1x8x8xf32> to vector<8x8xf32>
    %63 = vector.extract_strided_slice %56 {offsets = [3, 0, 0], sizes = [1, 8, 8], strides = [1, 1, 1]} : vector<4x8x8xf32> to vector<1x8x8xf32>
    %64 = vector.shape_cast %63 : vector<1x8x8xf32> to vector<8x8xf32>
    %65 = tpu.concatenate %58, %60, %62, %64 in 1 : vector<8x8xf32>, vector<8x8xf32>, vector<8x8xf32>, vector<8x8xf32> -> vector<8x32xf32>
    %c0_11 = arith.constant 0 : index
    %c0_12 = arith.constant 0 : index
    %66 = vector.load %arg4[%c0_11, %c0_12] : memref<32x32xf32, #tpu.memory_space<vmem>>, vector<32x32xf32>
    %cst_13 = arith.constant dense<0.000000e+00> : vector<8x32xf32>
    %67 = tpu.matmul %65, %66, %cst_13 {dimension_numbers = #tpu.dot_dimension_numbers<[1], [0], [0], [1], [0, 0, 1, 1], [], []>} : vector<8x32xf32>, vector<32x32xf32>, vector<8x32xf32> -> vector<8x32xf32>
    %c0_14 = arith.constant 0 : index
    %c0_15 = arith.constant 0 : index
    %68 = vector.load %arg5[%c0_14, %c0_15] : memref<1x32xf32, #tpu.memory_space<vmem>>, vector<1x32xf32>
    %69 = vector.broadcast %68 : vector<1x32xf32> to vector<8x32xf32>
    %70 = arith.addf %67, %69 : vector<8x32xf32>
    %c0_16 = arith.constant 0 : index
    %c0_17 = arith.constant 0 : index
    %71 = vector.load %arg6[%c0_16, %c0_17] : memref<8x32xf32, #tpu.memory_space<vmem>>, vector<8x32xf32>
    tpu.vector_store %arg6[%c0_16, %c0_17], %70 {strides = array<i32>} : memref<8x32xf32, #tpu.memory_space<vmem>>, vector<8x32xf32>,
    return
  }
  func.func @transform_0(%arg0: i32) -> (i32, i32) {
    %c0_i32 = arith.constant 0 : i32
    %c0_i32_0 = arith.constant 0 : i32
    return %arg0, %c0_i32 : i32, i32
  }
  func.func @transform_1(%arg0: i32) -> (i32, i32) {
    %c0_i32 = arith.constant 0 : i32
    %c0_i32_0 = arith.constant 0 : i32
    %c0_i32_1 = arith.constant 0 : i32
    return %c0_i32, %c0_i32_0 : i32, i32
  }
  func.func @transform_2(%arg0: i32) -> (i32, i32) {
    %c0_i32 = arith.constant 0 : i32
    %c0_i32_0 = arith.constant 0 : i32
    %c0_i32_1 = arith.constant 0 : i32
    return %c0_i32, %c0_i32_0 : i32, i32
  }
  func.func @transform_3(%arg0: i32) -> (i32, i32) {
    %c0_i32 = arith.constant 0 : i32
    %c0_i32_0 = arith.constant 0 : i32
    %c0_i32_1 = arith.constant 0 : i32
    return %c0_i32, %c0_i32_0 : i32, i32
  }
  func.func @transform_4(%arg0: i32) -> (i32, i32) {
    %c0_i32 = arith.constant 0 : i32
    %c0_i32_0 = arith.constant 0 : i32
    %c0_i32_1 = arith.constant 0 : i32
    return %c0_i32, %c0_i32_0 : i32, i32
  }
  func.func @transform_5(%arg0: i32) -> (i32, i32) {
    %c0_i32 = arith.constant 0 : i32
    %c0_i32_0 = arith.constant 0 : i32
    return %arg0, %c0_i32 : i32, i32
  }
}

</mosaic_0001>

<bundles_post_ra>
// kernel: tpu_custom_call.1
= control target key start
LH: loop header
LB: loop body
LE: loop exit
PB: predicated region body
PF: predicated region fallthrough
CT: control target
= control target key end

     0   :  { %10 = vsyncpa [#allocation3], 0  ;;  %s1975_s0 = inlined_call_operand.hbm [shape: f32[16,32], index: 0, kind: input, shape index: {}]   ;;  %s1976_s1 = inlined_call_operand.hbm [shape: f32[32,96], index: 1, kind: input, shape index: {}]   ;;  %s1977_s2 = inlined_call_operand.vmem [shape: f32[1,96], index: 2, kind: input, shape index: {}]   ;;  %s1978_s3 = inlined_call_operand.hbm [shape: f32[32,32], index: 3, kind: input, shape index: {}]   ;;  %s1979_s4 = inlined_call_operand.vmem [shape: f32[1,32], index: 4, kind: input, shape index: {}]   ;;  %s1980_s5 = inlined_call_operand.hbm [shape: f32[16,32], index: 5, kind: output, shape index: {}]  }
   0x1   :  { %12 = vsyncpa [#allocation3 + $0x1], 0 }
   0x2   :  { %13 = vsyncpa [#allocation6], 0 }
   0x3   :  { %14 = vsyncpa [#allocation4], 0 }
   0x4   :  { %16 = vsyncpa [#allocation4 + $0x1], 0  ;;  %s1672_s18 = smov 0   ;;  %s1674_s19 = smov 0  }
   0x5   :  { %s1676_s20 = smov 0   ;;  %s1678_s21 = smov 0  }
   0x6 LB: > { %s1693_s22 = sadd.s32 4294967295, %s1623_s21   ;;  %s1239_s23 = sadd.s32 4294967294, %s1623_s21   ;;  %s1623_s21 = sphi %s1678_s21, %s2000_s21   ;;  %s1619_s20 = sphi %s1676_s20, %s1999_s20   ;;  %s1615_s19 = sphi %s1674_s19, %s1998_s19   ;;  %s1611_s18 = sphi %s1672_s18, %s1997_s18  }
   0x7   : > { %p42_p0 = scmp.ne.s32.totalorder %s1615_s19, %s1611_s18  ;;  %p1981_p1 = scmp.eq.s32.totalorder %s1693_s22, 0 }
   0x8   : > { %p156_p3 = scmp.eq.s32.totalorder %s1239_s23, 1  ;;  %p1240_p5 = scmp.ge.s32.totalorder %s1623_s21, 1 }
   0x9   : > { %p1702_p4 = por %p1981_p1, %p42_p0  ;;  %p163_p7 = scmp.lt.s32.totalorder %s1623_s21, 3 }
   0xa   : > { %p1707_p6 = por %p156_p3, %p42_p0  ;;  %s1625_s27 = smov [#allocation5]  }
   0xb   : > { %s1984_s24 = scalar_select %p1702_p4, 1, 0 }
   0xc   : > { %s1985_s25 = scalar_select %p1707_p6, 1, 0 }
   0xd   : > { %p1712_p8 = pnand %p1240_p5, %p163_p7  ;;  %s175_s28 = sshll.u32 %s1625_s27, 4  ;;  %s1716_s28 = int_to_ptr.vmem [resolvable:$true] %s175_s28 }
   0xe   : > { %s1626_s30 = smov [#allocation7]   ;;  %s1467_s9 = scalar_lea.hbm %s1976_s1, 512 }
   0xf   : > { %p1383_p9 = pneg %p1712_p8  ;;  %s191_s6 = sshll.u32 %s1626_s30, 4  ;;  %s1727_s6 = int_to_ptr.vmem [resolvable:$true] %s191_s6 }
  0x10   : > { %p1468_p12 = scmp.ne.s32.totalorder %s1976_s1, %s1467_s9  ;;  %p1474_p5 = scmp.lt.u32.totalorder %s1467_s9, %s1976_s1 }
  0x11   : > { %p1723_p11 = pnand %p1383_p9, %p1981_p1 }
  0x13   : > { %p1469_p13 = pneg %p1723_p11 }
  0x15   : > { %p1470_p0 = pnand %p1469_p13, %p1468_p12 }
  0x17   : > { %p1471_p3 = pneg %p1470_p0 }
  0x19   : > { %p1476_p7 = pnand %p1474_p5, %p1471_p3 }
  0x1b   : > { %1479 = shalt.err (!%p1476_p7)
}
  0x1c   : > { %s1480_s14 = scalar_lea.vmem %s1716_s28, 512  ;;  %p1488_p2 = scmp.lt.s32.totalorder %s1716_s28, %s1716_s28 }
  0x1d   : > { %p1481_p9 = scmp.ne.s32.totalorder %s1716_s28, %s1480_s14  ;;  %p1489_p12 = scmp.lt.s32.totalorder %s1480_s14, %s1480_s14 }
  0x1f   : > { %p1483_p10 = pnand %p1481_p9, %p1469_p13  ;;  %p1490_p0 = por %p1489_p12, %p1488_p2 }
  0x21   : > { %p1484_p1 = pneg %p1483_p10 }
  0x23   : > { %p1491_p6 = pnand %p1490_p0, %p1484_p1 }
  0x25   : > { %1494 = shalt.err (!%p1491_p6)
}
  0x26   : > { %s1627_s15 = smov 128   ;;  %s1628_s16 = smov 8  }
  0x27   : > { %1386 = dma.hbm_to_vmem [thread:$0]  (!%p1723_p11), %s1976_s1, 512, %s1716_s28, [#allocation6], %s1627_s15, %s1627_s15, %s1628_s16  }
  0x28   : > { %s1495_s7 = scalar_lea.hbm %s1978_s3, 512 }
  0x29   : > { %p1496_p2 = scmp.ne.s32.totalorder %s1978_s3, %s1495_s7  ;;  %p1502_p10 = scmp.lt.u32.totalorder %s1495_s7, %s1978_s3 }
  0x2b   : > { %p1498_p1 = pnand %p1496_p2, %p1469_p13 }
  0x2d   : > { %p1499_p6 = pneg %p1498_p1 }
  0x2f   : > { %p1504_p3 = pnand %p1502_p10, %p1499_p6 }
  0x31   : > { %1507 = shalt.err (!%p1504_p3)
}
  0x32   : > { %s1508_s28 = scalar_lea.vmem %s1727_s6, 512  ;;  %p1516_p12 = scmp.lt.s32.totalorder %s1727_s6, %s1727_s6 }
  0x33   : > { %p1509_p5 = scmp.ne.s32.totalorder %s1727_s6, %s1508_s28  ;;  %p1517_p0 = scmp.lt.s32.totalorder %s1508_s28, %s1508_s28 }
  0x35   : > { %p1511_p7 = pnand %p1509_p5, %p1469_p13  ;;  %p1518_p2 = por %p1517_p0, %p1516_p12 }
  0x37   : > { %p1512_p9 = pneg %p1511_p7 }
  0x39   : > { %p1519_p1 = pnand %p1518_p2, %p1512_p9 }
  0x3b   : > { %1522 = shalt.err (!%p1519_p1)
}
  0x3c   : > { %1389 = dma.hbm_to_vmem [thread:$0]  (!%p1723_p11), %s1978_s3, 512, %s1727_s6, [#allocation6], %s1627_s15, %s1627_s15, %s1628_s16  }
  0x3d   : > { %s1782_s14 = sadd.s32 1, %s1623_s21   ;;  %s29_s29 = sadd.s32 1, %s1619_s20 }
  0x3e   : > { %s26_s17 = ssub.s32 %s1623_s21, %s1782_s14  ;;  %p36_p13 = scmp.ne.s32.totalorder %s1619_s20, %s1615_s19 }
  0x3f   : > { %p27_p6 = scmp.eq.s32.totalorder %s26_s17, 0  ;;  %p37_p10 = scmp.eq.s32.totalorder %s1623_s21, 0 }
  0x40   : > { %p1988_p3 = scmp.eq.s32.totalorder %s1693_s22, 1  ;;  %p1400_p7 = scmp.lt.s32.totalorder %s1623_s21, 2 }
  0x41   : > { %s1798_s27 = scalar_select %p27_p6, %s1619_s20, %s29_s29  }
  0x42   : > { %p1792_p5 = por %p1988_p3, %p36_p13  ;;  %p38_p9 = por %p37_p10, %p36_p13 }
  0x43   : > { %s208_s30 = sand.u32 1, %s1619_s20   ;;  %s1245_s6 = sshll.u32 %s1623_s21, 7 }
  0x44   : > { %s1989_s23 = scalar_select %p1792_p5, 1, 0 }
  0x45   : > { %s1244_s7 = sshll.u32 %s208_s30, 3  ;;  %s1805_s8 = scalar_lea.hbm %s1975_s0, %s1245_s6 }
  0x46   : > { %s212_s9 = scalar_lea.vmem [#allocation2], %s1244_s7  ;;  %p1809_p11 = pnand %p1400_p7, %p38_p9 }
  0x47   : > { %s219_s10 = sshll.u32 %s212_s9, 4  ;;  %s209_s28 = scalar_lea.sflag [#allocation3], %s208_s30  ;;  %s1807_s10 = int_to_ptr.vmem [resolvable:$true] %s219_s10 }
  0x48   : > { %s1523_s12 = scalar_lea.hbm %s1805_s8, 128  ;;  %p1525_p0 = pneg %p1809_p11 }
  0x49   : > { %p1524_p12 = scmp.ne.s32.totalorder %s1805_s8, %s1523_s12  ;;  %s1528_s17 = scalar_lea.hbm %s1975_s0, 256 }
  0x4a   : > { %p1529_p13 = scmp.lt.u32.totalorder %s1805_s8, %s1975_s0  ;;  %p1530_p6 = scmp.lt.u32.totalorder %s1528_s17, %s1523_s12 }
  0x4b   : > { %p1526_p2 = pnand %p1525_p0, %p1524_p12  ;;  %p1532_p3 = scmp.lt.u32.totalorder %s1523_s12, %s1805_s8 }
  0x4c   : > { %p1531_p10 = por %p1530_p6, %p1529_p13 }
  0x4d   : > { %p1527_p1 = pneg %p1526_p2 }
  0x4e   : > { %p1533_p7 = por %p1532_p3, %p1531_p10 }
  0x50   : > { %p1534_p9 = pnand %p1533_p7, %p1527_p1 }
  0x52   : > { %1537 = shalt.err (!%p1534_p9)
}
  0x53   : > { %s1538_s30 = scalar_lea.vmem %s1807_s10, 128  ;;  %s1629_s15 = smov [#allocation2]  }
  0x54   : > { %p1539_p12 = scmp.ne.s32.totalorder %s1807_s10, %s1538_s30  ;;  %s1543_s16 = sshll.u32 %s1629_s15, 4  ;;  %s1544_s16 = int_to_ptr.vmem [resolvable:$false] %s1543_s16 }
  0x55   : > { %s1545_s9 = scalar_lea.vmem %s1544_s16, 256  ;;  %p1546_p4 = scmp.lt.s32.totalorder %s1807_s10, %s1544_s16 }
  0x56   : > { %p1541_p2 = pnand %p1539_p12, %p1525_p0  ;;  %p1547_p13 = scmp.lt.s32.totalorder %s1545_s9, %s1538_s30 }
  0x58   : > { %p1542_p5 = pneg %p1541_p2  ;;  %p1548_p6 = por %p1547_p13, %p1546_p4 }
  0x5a   : > { %p1549_p10 = pnand %p1548_p6, %p1542_p5 }
  0x5c   : > { %1552 = shalt.err (!%p1549_p10)
}
  0x5d   : > { %1393 = dma.hbm_to_vmem [thread:$0]  (!%p1809_p11), %s1805_s8, 128, %s1807_s10, %s209_s28  }
  0x5e   : > { %228 = sbr.rel (%p1712_p8) target bundleno = 1499 (0x5db), region = 40  ;;  %s1841_s12 = sand.u32 (!%p1712_p8), 1, %s1615_s19  }
  0x5f   : > { %s1247_s13 = sshll.u32 (!%p1712_p8), %s1841_s12, 3  ;;  %s231_s29 = scalar_lea.sflag (!%p1712_p8), [#allocation3], %s1841_s12 }
  0x60   : > { %s234_s17 = scalar_lea.vmem (!%p1712_p8), [#allocation2], %s1247_s13  ;;  %p1991_p4 = scmp.ne.s32.totalorder (!%p1712_p8), %s1984_s24, 0 }
  0x65   : > { %1598 = dma.done.wait (%p1991_p4), %s231_s29, 128  }
  0x66   : > { %1600 = vsyncadd (%p1991_p4), %s231_s29, 4294967168  ;;  %p1992_p5 = scmp.eq.s32.totalorder %s1693_s22, 0 }
  0x68   : > { %1602 = dma.done.wait (%p1992_p5), [#allocation6], 1024   ;;  %p1993_p8 = pmov %p1992_p5 }
  0x69   : > { %v1630_v0 = vmov 0.0|0.0   ;;  %vm1631_vm0 = vmmov 0   ;;  %v1632_v1 = vmov 0.0   ;;  %v270_v2 = vld [vmem:[#allocation5] sm:$0xff]  ;;  %v271_v3 = vld [vmem:[#allocation5 + $0x8] sm:$0xff]  ;;  %v272_v4 = vld [vmem:[#allocation5 + $0x10] sm:$0xff]  ;;  %v675_v25 = vlaneseq }
  0x6a   : > { %1604 = vsyncadd (%p1993_p8), [#allocation6], 4294966272  ;;  %1359 = vmatprep.subr.bf16.mxu0 %v1630_v0  ;;  %1305 = vmatprep.mubr.msk.f32.mxu0 %vm1631_vm0, %v1632_v1  ;;  %v1360_v5 = vpack.c.bf16 %v271_v3, %v270_v2  ;;  %v273_v6 = vld [vmem:[#allocation5 + $0x18] sm:$0xff]  ;;  %vm281_vm1 = vcmask 261120   ;;  %v1251_v9 = vld [vmem:[%s1977_s2] ss:$0 sm:$0xff] }
  0x6b   : > { %1308 = vmatprep.subr.mxu1 %v1632_v1  ;;  %1310 = vmatprep.mubr.msk.f32.mxu1 %vm1631_vm0, %v1632_v1  ;;  %v1363_v7 = vpack.c.bf16 %v273_v6, %v272_v4  ;;  %v269_v8 = vld [vmem:[%s234_s17] sm:$0xff]  ;;  %s1633_s8 = smov 104   ;;  %s1634_s10 = smov 120   ;;  %vm372_vm2 = vcmask 64512   ;;  %v676_v26 = vshrl.u32 %v675_v25, 7  ;;  %v678_v27 = vand.u32 127, %v675_v25 }
  0x6c   : > { %1361 = vmatpush3.bf16.msra.mxu0 %v1360_v5  ;;  %s1635_s11 = smov 96   ;;  %s1636_s28 = smov 112   ;;  %vm1047_vm4 = vcmask 130048   ;;  %vm1049_vm5 = vcmask 195584  }
  0x6d   : > { %1362 = vmatprep.subr.bf16.mxu0 %v1630_v0  ;;  %s1637_s7 = smov 64   ;;  %vm679_vm3 = vcmp.ge.s32.totalorder %v676_v26, %v678_v27  ;;  %s1638_s6 = smov 8  }
  0x6e   : > { %s1639_s30 = smov 16   ;;  %s1640_s15 = smov 24  }
  0x6f   : > { %s1268_s29 = sshll.u32 %s1693_s22, 7  ;;  %s268_s17 = scalar_lea.vmem [#allocation8], %s1247_s13 }
  0x70   : > { %1364 = vmatpush3.bf16.msra.mxu0 %v1363_v7  ;;  %s1150_s24 = sshll.u32 %s268_s17, 4  ;;  %p1994_p0 = scmp.ne.s32.totalorder %s1989_s23, 0  ;;  %s1932_s24 = int_to_ptr.vmem [resolvable:$true] %s1150_s24 }
  0x71   : > { %1328 = vmatprep.subr.mxu0 %v1632_v1  ;;  %s1553_s22 = scalar_lea.vmem %s1932_s24, 128  ;;  %s1641_s13 = smov [#allocation8]  }
  0x72   : > { %p1554_p11 = scmp.ne.s32.totalorder %s1932_s24, %s1553_s22 }
  0x73   : > { %1306 = vmatmul.mubr.msk.f32.vlgmr.msra.gmra.mrb[0].mxu0 %vm281_vm1, %v269_v8  ;;  %v1051_v8 = vld [vmem:[#allocation7] sm:$0xff] }
  0x74   : > { %1330 = vmatprep.mubr.msk.f32.mxu0 %vm1631_vm0, %v1632_v1  ;;  %p1555_p1 = pnand %p1554_p11, %p1994_p0 }
  0x76   : > { %p1556_p3 = pneg %p1555_p1 }
 0x146   : > { %v351_v10 = vpop.f32.mrb[0].mxu0 }
 0x147   : > { %v352_v11 = vadd.f32 %v1251_v9, %v351_v10  ;;  %v1307_v12 = vpop.f32.mrb[1].mxu0  ;;  %v1052_v9 = vld [vmem:[#allocation7 + $0x8] sm:$0xff] }
 0x148   : > { %v1054_v12 = vld [vmem:[#allocation7 + $0x18] sm:$0xff] }
 0x149   : > { %368 = vrot.lane.b32.xlu1 %v352_v11, %s1633_s8  ;;  %364 = vrot.lane.b32.xlu0 %v352_v11, %s1634_s10  ;;  %v355_v13 = vmul.f32 0.35355338, %v352_v11 }
 0x14d   : > { %370 = vrot.lane.b32.xlu1 %v352_v11, %s1635_s11  ;;  %366 = vrot.lane.b32.xlu0 %v352_v11, %s1636_s28 }
 0x151   : > { %357 = vrot.lane.b32.xlu1 %v355_v13, %s1634_s10  ;;  %s1930_s10 = scalar_lea.hbm %s1980_s5, %s1268_s29 }
 0x155   : > { %359 = vrot.lane.b32.xlu1 %v355_v13, %s1636_s28  ;;  %s1557_s28 = sshll.u32 %s1641_s13, 4  ;;  %s1558_s28 = int_to_ptr.vmem [resolvable:$false] %s1557_s28 }
 0x156   : > { %p1560_p7 = scmp.lt.s32.totalorder %s1932_s24, %s1558_s28 }
 0x159   : > { %361 = vrot.lane.b32.xlu1 %v355_v13, %s1633_s8 }
 0x15d   : > { %722 = vrot.lane.b32.xlu1 %v352_v11, %s1637_s7  ;;  %v1366_v11 = vpack.c.bf16 %v1052_v9, %v1051_v8 }
 0x1bb   : > { %v369_v14 = vpop.permute.xlu1 %368  ;;  %v365_v15 = vpop.permute.xlu0 %364 }
 0x1bc   : > { %447 = vrot.lane.b32.xlu0 %v365_v15, %s1635_s11 }
 0x1bf   : > { %v371_v16 = vpop.permute.xlu1 %370  ;;  %v367_v17 = vpop.permute.xlu0 %366 }
 0x1c0   : > { %1309 = vmatpush3.xpose.msk.msra.mxu1 %vm372_vm2, %v371_v16  ;;  %523 = vrot.lane.b32.xlu0 %v367_v17, %s1635_s11 }
 0x1c1   : > { %1313 = vmatprep.subr.mxu1 %v1632_v1 }
 0x1c3   : > { %v358_v18 = vpop.permute.xlu1 %357  ;;  %1311 = vmatmul.mubr.msk.f32.vlgmr.msra.gmra.mrb[0].mxu1 %vm372_vm2, %v355_v13 }
 0x1c4   : > { %599 = vrot.lane.b32.xlu0 %v369_v14, %s1635_s11  ;;  %1315 = vmatprep.mubr.msk.f32.mxu1 %vm1631_vm0, %v1632_v1  ;;  %s1137_s11 = scalar_lea.sflag [#allocation4], %s1841_s12 }
 0x1c7   : > { %v360_v19 = vpop.permute.xlu1 %359 }
 0x1cb   : > { %v362_v20 = vpop.permute.xlu1 %361 }
 0x1cf   : > { %v723_v21 = vpop.permute.xlu1 %722 }
 0x1d0   : > { %1329 = vmatpush3.msra.mxu0 %v723_v21 }
 0x1d1   : > { %1338 = vmatprep.subr.mxu0 %v1632_v1 }
 0x22e   : > { %v448_v22 = vpop.permute.xlu0 %447 }
 0x22f   : > { %1314 = vmatpush3.xpose.msk.msra.mxu1 %vm372_vm2, %v448_v22 }
 0x230   : > { %1318 = vmatprep.subr.mxu1 %v1632_v1 }
 0x232   : > { %v524_v23 = vpop.permute.xlu0 %523  ;;  %1316 = vmatmul.mubr.msk.f32.vlgmr.msra.gmra.mrb[2].mxu1 %vm372_vm2, %v358_v18 }
 0x233   : > { %1319 = vmatpush3.xpose.msk.msra.mxu1 %vm372_vm2, %v524_v23  ;;  %1320 = vmatprep.mubr.msk.f32.mxu1 %vm1631_vm0, %v1632_v1 }
 0x234   : > { %1323 = vmatprep.subr.mxu1 %v1632_v1 }
 0x236   : > { %v600_v24 = vpop.permute.xlu0 %599  ;;  %1321 = vmatmul.mubr.msk.f32.vlgmr.msra.gmra.mrb[4].mxu1 %vm372_vm2, %v360_v19 }
 0x237   : > { %1324 = vmatpush3.xpose.msk.msra.mxu1 %vm372_vm2, %v600_v24  ;;  %1325 = vmatprep.mubr.msk.f32.mxu1 %vm1631_vm0, %v1632_v1 }
 0x238   : > { %1333 = vmatprep.subr.mxu1 %v1632_v1 }
 0x23a   : > { %1326 = vmatmul.mubr.msk.f32.vlgmr.msra.gmra.mrb[6].mxu1 %vm372_vm2, %v362_v20 }
 0x23b   : > { %1335 = vmatprep.mubr.msk.f32.mxu1 %vm1631_vm0, %v1632_v1 }
 0x296   : > { %v443_v28 = vpop.f32.mrb[0].mxu1 }
 0x297   : > { %v682_v29 = vsel %vm679_vm3, %v443_v28, -1e+30  ;;  %v1312_v30 = vpop.f32.mrb[1].mxu1 }
 0x298   : > { %v686_v31 = vsel %vm372_vm2, %v682_v29, -inf }
 0x299   : > { %687 = vmax.xlane.f32.xlu0 %v686_v31 }
 0x305   : > { %v519_v32 = vpop.f32.mrb[2].mxu1 }
 0x306   : > { %v683_v33 = vsel %vm679_vm3, %v519_v32, -1e+30  ;;  %v1317_v34 = vpop.f32.mrb[3].mxu1 }
 0x307   : > { %v689_v35 = vsel %vm372_vm2, %v683_v33, -inf }
 0x308   : > { %690 = vmax.xlane.f32.xlu1 %v689_v35  ;;  %v1265_v35 = vld [vmem:[%s1979_s4] ss:$0 sm:$0xff] }
 0x309   : > { %v595_v36 = vpop.f32.mrb[4].mxu1 }
 0x30a   : > { %v684_v37 = vsel %vm679_vm3, %v595_v36, -1e+30  ;;  %v1322_v38 = vpop.f32.mrb[5].mxu1 }
 0x30b   : > { %v692_v39 = vsel %vm372_vm2, %v684_v37, -inf }
 0x30c   : > { %693 = vmax.xlane.f32.xlu0 %v692_v39 }
 0x30d   : > { %v671_v40 = vpop.f32.mrb[6].mxu1 }
 0x30e   : > { %v685_v41 = vsel %vm679_vm3, %v671_v40, -1e+30  ;;  %v1327_v42 = vpop.f32.mrb[7].mxu1 }
 0x30f   : > { %v695_v43 = vsel %vm372_vm2, %v685_v41, -inf }
 0x310   : > { %696 = vmax.xlane.f32.xlu0 %v695_v43 }
 0x319   : > { %874 = vrot.lane.b32.xlu1 %v367_v17, %s1637_s7 }
 0x31d   : > { %950 = vrot.lane.b32.xlu1 %v369_v14, %s1637_s7 }
 0x326   : > { %v688_v44 = vpop.xlane.xlu0 %687  ;;  %798 = vrot.lane.b32.xlu0 %v365_v15, %s1637_s7  ;;  %s1559_s7 = scalar_lea.vmem %s1558_s28, 256 }
 0x327   : > { %v698_v45 = vsub.f32 %v682_v29, %v688_v44  ;;  %p1561_p9 = scmp.lt.s32.totalorder %s1559_s7, %s1553_s22 }
 0x329   : > { %v702_v46 = vmul.f32 1.442695, %v698_v45  ;;  %p1562_p12 = por %p1561_p9, %p1560_p7 }
 0x32b   : > { %1451 = vpow2.f32 %v702_v46  ;;  %p1563_p2 = pnand %p1562_p12, %p1556_p3 }
 0x335   : > { %v1452_v47 = vpop.eup %1451 }
 0x336   : > { %1331 = vmatmul.mubr.msk.f32.vlgmr.msra.gmra.mrb[2].mxu0 %vm372_vm2, %v1452_v47  ;;  %v710_v4 = vsel %vm372_vm2, %v1452_v47, 0.0 }
 0x337   : > { %1340 = vmatprep.mubr.msk.f32.mxu0 %vm1631_vm0, %v1632_v1 }
 0x395   : > { %v691_v48 = vpop.xlane.xlu1 %690 }
 0x396   : > { %v699_v49 = vsub.f32 %v683_v33, %v691_v48 }
 0x398   : > { %v704_v50 = vmul.f32 1.442695, %v699_v49 }
 0x399   : > { %v875_v51 = vpop.permute.xlu1 %874  ;;  %v694_v52 = vpop.xlane.xlu0 %693 }
 0x39a   : > { %1453 = vpow2.f32 %v704_v50  ;;  %v700_v53 = vsub.f32 %v684_v37, %v694_v52  ;;  %1339 = vmatpush3.msra.mxu0 %v875_v51 }
 0x39b   : > { %1365 = vmatprep.subr.bf16.mxu0 %v1630_v0 }
 0x39c   : > { %v706_v54 = vmul.f32 1.442695, %v700_v53 }
 0x39d   : > { %v697_v55 = vpop.xlane.xlu0 %696  ;;  %v951_v60 = vpop.permute.xlu1 %950 }
 0x39e   : > { %1455 = vpow2.f32 %v706_v54  ;;  %v701_v56 = vsub.f32 %v685_v41, %v697_v55 }
 0x3a0   : > { %v708_v57 = vmul.f32 1.442695, %v701_v56 }
 0x3a1   : > { %v799_v58 = vpop.permute.xlu0 %798 }
 0x3a2   : > { %1457 = vpow2.f32 %v708_v57  ;;  %1334 = vmatpush3.msra.mxu1 %v799_v58 }
 0x3a3   : > { %1343 = vmatprep.subr.mxu1 %v1632_v1 }
 0x3a4   : > { %v1454_v59 = vpop.eup %1453 }
 0x3a5   : > { %1336 = vmatmul.mubr.msk.f32.vlgmr.msra.gmra.mrb[8].mxu1 %vm372_vm2, %v1454_v59  ;;  %v713_v61 = vsel %vm372_vm2, %v1454_v59, 0.0 }
 0x3a6   : > { %1344 = vmatpush3.msra.mxu1 %v951_v60  ;;  %714 = vadd.xlane.f32.xlu0 %v713_v61 }
 0x3a7   : > { %1345 = vmatprep.mubr.msk.f32.mxu1 %vm1631_vm0, %v1632_v1 }
 0x3a8   : > { %v1456_v62 = vpop.eup %1455 }
 0x3a9   : > { %1341 = vmatmul.mubr.msk.f32.vlgmr.msra.gmra.mrb[4].mxu0 %vm372_vm2, %v1456_v62  ;;  %v716_v63 = vsel %vm372_vm2, %v1456_v62, 0.0 }
 0x3aa   : > { %717 = vadd.xlane.f32.xlu1 %v716_v63  ;;  %1356 = vmatprep.mubr.msk.f32.mxu0 %vm1631_vm0, %v1632_v1  ;;  %v1053_v1 = vld [vmem:[#allocation7 + $0x10] sm:$0xff] }
 0x3ab   : > { %1367 = vmatpush3.bf16.msra.mxu0 %v1366_v11  ;;  %v1369_v14 = vpack.c.bf16 %v1054_v12, %v1053_v1 }
 0x3ac   : > { %v1458_v2 = vpop.eup %1457  ;;  %1368 = vmatprep.subr.bf16.mxu0 %v1630_v0 }
 0x3ad   : > { %1346 = vmatmul.mubr.msk.f32.vlgmr.msra.gmra.mrb[10].mxu1 %vm372_vm2, %v1458_v2  ;;  %v719_v3 = vsel %vm372_vm2, %v1458_v2, 0.0 }
 0x3ae   : > { %720 = vadd.xlane.f32.xlu0 %v719_v3 }
 0x3af   : > { %1370 = vmatpush3.bf16.msra.mxu0 %v1369_v14 }
 0x3b2   : > { %711 = vadd.xlane.f32.xlu0 %v710_v4 }
 0x409   : > { %v794_v5 = vpop.f32.mrb[2].mxu0 }
 0x40a   : > { %v1332_v6 = vpop.f32.mrb[3].mxu0 }
 0x433   : > { %v715_v7 = vpop.xlane.xlu0 %714 }
 0x434   : > { %1459 = vrcp.f32 %v715_v7 }
 0x437   : > { %v718_v10 = vpop.xlane.xlu1 %717 }
 0x438   : > { %1461 = vrcp.f32 %v718_v10 }
 0x43b   : > { %v721_v13 = vpop.xlane.xlu0 %720 }
 0x43c   : > { %1463 = vrcp.f32 %v721_v13 }
 0x43e   : > { %v1460_v15 = vpop.eup %1459 }
 0x43f   : > { %v712_v26 = vpop.xlane.xlu0 %711 }
 0x440   : > { %1465 = vrcp.f32 %v712_v26 }
 0x442   : > { %v1462_v19 = vpop.eup %1461 }
 0x446   : > { %v1464_v23 = vpop.eup %1463 }
 0x44a   : > { %v1466_v27 = vpop.eup %1465 }
 0x44b   : > { %v1027_v29 = vmul.f32 %v1466_v27, %v794_v5 }
 0x478   : > { %v870_v16 = vpop.f32.mrb[8].mxu1 }
 0x479   : > { %v1029_v17 = vmul.f32 %v1460_v15, %v870_v16  ;;  %v1337_v18 = vpop.f32.mrb[9].mxu1 }
 0x47b   : > { %1035 = vrot.lane.b32.xlu1 %v1029_v17, %s1638_s6 }
 0x47c   : > { %v946_v20 = vpop.f32.mrb[4].mxu0 }
 0x47d   : > { %v1031_v21 = vmul.f32 %v1462_v19, %v946_v20  ;;  %v1342_v22 = vpop.f32.mrb[5].mxu0 }
 0x47f   : > { %1039 = vrot.lane.b32.xlu0 %v1031_v21, %s1639_s30 }
 0x480   : > { %v1022_v0 = vpop.f32.mrb[10].mxu1 }
 0x481   : > { %v1033_v24 = vmul.f32 %v1464_v23, %v1022_v0  ;;  %v1347_v25 = vpop.f32.mrb[11].mxu1 }
 0x483   : > { %1043 = vrot.lane.b32.xlu1 %v1033_v24, %s1640_s15 }
 0x4ed   : > { %v1036_v28 = vpop.permute.xlu1 %1035 }
 0x4ee   : > { %v1046_v31 = vsel %vm372_vm2, %v1027_v29, %v1036_v28 }
 0x4f1   : > { %v1040_v30 = vpop.permute.xlu0 %1039 }
 0x4f2   : > { %v1048_v32 = vsel %vm1047_vm4, %v1046_v31, %v1040_v30 }
 0x4f5   : > { %v1044_v33 = vpop.permute.xlu1 %1043 }
 0x4f6   : > { %v1050_v34 = vsel %vm1049_vm5, %v1048_v32, %v1044_v33 }
 0x4f7   : > { %1357 = vmatmul.mubr.msk.f32.vlgmr.msra.gmra.mrb[6].mxu0 %vm281_vm1, %v1050_v34 }
 0x5ca   : > { %v1131_v36 = vpop.f32.mrb[6].mxu0 }
 0x5cb   : > { %v1132_v37 = vadd.f32 %v1265_v35, %v1131_v36  ;;  %v1358_v38 = vpop.f32.mrb[7].mxu0 }
 0x5cd   : > { %1135 = vst.msk [vmem:[%s268_s17] sm:$0xff] %vm281_vm1, %v1132_v37 }
 0x5ce   : > { %1566 = shalt.err (!%p1563_p2)
}
 0x5cf   : > { %s1567_s12 = scalar_lea.hbm %s1930_s10, 128  ;;  %s1571_s15 = scalar_lea.hbm %s1980_s5, 256 }
 0x5d0   : > { %p1568_p13 = scmp.ne.s32.totalorder %s1930_s10, %s1567_s12  ;;  %p1572_p4 = scmp.lt.u32.totalorder %s1930_s10, %s1980_s5 }
 0x5d1   : > { %p1573_p5 = scmp.lt.u32.totalorder %s1571_s15, %s1567_s12  ;;  %p1575_p11 = scmp.lt.u32.totalorder %s1567_s12, %s1930_s10 }
 0x5d2   : > { %p1569_p6 = pnand %p1568_p13, %p1994_p0 }
 0x5d3   : > { %p1574_p8 = por %p1573_p5, %p1572_p4 }
 0x5d4   : > { %p1570_p10 = pneg %p1569_p6 }
 0x5d5   : > { %p1576_p1 = por %p1575_p11, %p1574_p8 }
 0x5d7   : > { %p1577_p3 = pnand %p1576_p1, %p1570_p10 }
 0x5d9   : > { %1580 = shalt.err (!%p1577_p3)
}
 0x5da   : > { %1381 = dma.vmem_to_hbm [thread:$0]  (%p1994_p0), %s1932_s24, 128, %s1930_s10, %s1137_s11  }
 0x5db PF: > { %s1162_s29 = sand.u32 1, %s1611_s18   ;;  %p1995_p7 = scmp.ne.s32.totalorder %s1985_s25, 0 }
 0x5dc   : > { %p1996_p9 = scmp.ge.s32.totalorder %s1623_s21, 2  ;;  %s1163_s17 = scalar_lea.sflag [#allocation4], %s1162_s29 }
 0x5de   : > { %p1395_p12 = pnand %p1996_p9, %p1995_p7 }
 0x5e0   : > { %1606 = dma.done.wait (!%p1395_p12), %s1163_s17, 128  }
 0x5e1   : > { %1608 = vsyncadd (!%p1395_p12), %s1163_s17, 4294967168  ;;  %p19_p2 = scmp.ge.s32.totalorder %s1782_s14, 4   ;;  %s1997_s18 = smov %s1615_s19 }
 0x5e2   : > { %s1998_s19 = smov %s1619_s20  ;;  %s1999_s20 = smov %s1798_s27 }
 0x5e3   : > { %s2000_s21 = smov %s1782_s14  ;;  %21 = sbr.rel (!%p19_p2) target bundleno = 6 (0x6), region = 93 }
 0x5ea   :  { %1168 = vsyncpa [#allocation3], 1 }
 0x5eb   :  { %1170 = vsyncpa [#allocation3 + $0x1], 1 }
 0x5ec   :  { %1171 = vsyncpa [#allocation6], 1 }
 0x5ed   :  { %1172 = vsyncpa [#allocation4], 1 }
 0x5ee   :  { %1174 = vsyncpa [#allocation4 + $0x1], 1 }

</bundles_post_ra>
